<compile_context>
chip_gen: v7x
topology: tpu7x:2x2x1
jax: 0.10.0
libtpu: 0.0.40
codegen_flags: <defaults>
</compile_context>

<pallas_src>
import functools

import jax
import jax.numpy as jnp
from jax import lax
from jax.experimental import pallas as pl
from jax.experimental.pallas import tpu as pltpu


def _round_up(x, m):
    return ((x + m - 1) // m) * m


def _pick_tn(C):
    """Lane-dense class tile; keep >=2 class tiles when C allows (megacore)."""
    n_lane = pl.cdiv(C, 128)
    if n_lane <= 1:
        return 128
    return max(128, min(512, (n_lane // 2) * 128))


# ---------------- fused kernel: y = x @ W + b  and  S = sum_d |W|^p ----------
def _fused_logits_colsum_kernel(x_ref, w_ref, b_ref, y_ref, s_ref,
                                acc_y, acc_s, *, p, tk, d_valid, x_resident):
    k = pl.program_id(1)                          # reduction over D tiles

    @pl.when(k == 0)
    def _init():
        acc_y[...] = jnp.zeros_like(acc_y)
        acc_s[...] = jnp.zeros_like(acc_s)

    w = w_ref[...]                                # (tk, tn) tile of W
    if d_valid % tk != 0:
        # Last D tile is ragged: out-of-bounds rows of the partial block hold
        # unspecified data; zero them (sublane mask) so neither the matmul nor
        # the column sums are contaminated.  Emitted only when D % tk != 0.
        row = lax.broadcasted_iota(jnp.int32, w.shape, 0)
        w = jnp.where(row < (d_valid - k * tk), w, jnp.zeros_like(w))

    if x_resident:
        # x lives in VMEM for the whole grid; slice the current K chunk.
        start = pl.multiple_of(k * tk, 128)
        xt = x_ref[:, pl.ds(start, tk)]
    else:
        xt = x_ref[...]

    # logits accumulation (MXU)
    acc_y[...] += jnp.dot(xt, w, preferred_element_type=jnp.float32)

    # per-class |W|^p partial sums.  Accumulate per sublane group (8, tn):
    # the reshape is layout-preserving, so this is pure vreg-wise VALU adds
    # that hide under the W DMA; the 8->1 XLU collapse happens once at the end.
    wf = w.astype(jnp.float32)
    if p == 1:
        a = jnp.abs(wf)
    elif p == 2:
        a = wf * wf
    else:
        a = jnp.abs(wf) ** p                      # generic pow (EUP); rare
    acc_s[...] += jnp.sum(a.reshape(tk // 8, 8, a.shape[-1]), axis=0)

    @pl.when(k == pl.num_programs(1) - 1)
    def _fini():
        y_ref[...] = (acc_y[...] + b_ref[...].astype(jnp.float32)).astype(y_ref.dtype)
        s_ref[...] = jnp.sum(acc_s[...], axis=0, keepdims=True).astype(s_ref.dtype)


def fused_logits_and_colsums(x_flat, W, b, *, p=1, tk_max=1024,
                             x_resident_limit=8 << 20):
    """Returns (y[B, C], S[C]) with S[c] = sum_d |W[d, c]|^p, one pass over W.

    W is streamed from HBM un-padded (bf16 W also works; accumulation is f32).
    """
    Bsz, D = x_flat.shape
    Dw, C = W.shape
    assert Dw == D

    # --- D (reduction) tiling: bounded padding, 128-aligned lane slices of x.
    # Note: Dp padding only affects x (tiny) and masked compute; W's HBM
    # traffic is exactly D*C elements because partial blocks clip the DMA.
    nk = pl.cdiv(D, max(128, tk_max))
    tk = _round_up(pl.cdiv(D, nk), 128)
    nk = pl.cdiv(D, tk)
    Dp = nk * tk

    # --- class tiling (lane-dense, multiple of 128)
    tn = _pick_tn(C)
    nj = pl.cdiv(C, tn)

    # x is tiny relative to W: zero-pad only its D tail (W itself is NOT padded).
    if Dp != D:
        x_flat = jnp.pad(x_flat, ((0, 0), (0, Dp - D)))
    b2d = b.reshape(1, C)

    # Hold x resident in VMEM across the grid when it fits (typical case);
    # otherwise fall back to per-step x tiles.
    x_resident = (Bsz * Dp * x_flat.dtype.itemsize) <= x_resident_limit
    if x_resident:
        x_spec = pl.BlockSpec((Bsz, Dp), lambda j, k: (0, 0))
    else:
        x_spec = pl.BlockSpec((Bsz, tk), lambda j, k: (0, k))

    kern = functools.partial(_fused_logits_colsum_kernel,
                             p=p, tk=tk, d_valid=D, x_resident=x_resident)

    cost = pl.CostEstimate(
        flops=2 * Bsz * D * C + 2 * D * C,
        transcendentals=0 if p in (1, 2) else D * C,
        bytes_accessed=(W.size * W.dtype.itemsize
                        + x_flat.size * x_flat.dtype.itemsize
                        + Bsz * C * 4 + C * 4 + C * b.dtype.itemsize),
    )

    # VMEM: W tile double-buffered (tk*tn*4*2 <= ~1 MiB here, <= 4 MiB for
    # tk=1024/tn=512) + resident x + small accumulators -> well inside the
    # scoped-VMEM default on v5e/v6e/v7x; no vmem_limit_bytes override needed.
    y, s = pl.pallas_call(
        kern,
        out_shape=(jax.ShapeDtypeStruct((Bsz, C), jnp.float32),
                   jax.ShapeDtypeStruct((1, C), jnp.float32)),
        grid_spec=pltpu.PrefetchScalarGridSpec(
            num_scalar_prefetch=0,
            grid=(nj, nk),                        # (class tiles, D reduction)
            in_specs=[
                x_spec,                                          # x
                pl.BlockSpec((tk, tn), lambda j, k: (k, j)),     # W (un-padded)
                pl.BlockSpec((1, tn), lambda j, k: (0, j)),      # b
            ],
            out_specs=(
                pl.BlockSpec((Bsz, tn), lambda j, k: (0, j)),    # y
                pl.BlockSpec((1, tn), lambda j, k: (0, j)),      # S
            ),
            scratch_shapes=[pltpu.VMEM((Bsz, tn), jnp.float32),
                            pltpu.VMEM((8, tn), jnp.float32)],
        ),
        compiler_params=pltpu.CompilerParams(
            dimension_semantics=("parallel", "arbitrary")),
        cost_estimate=cost,
    )(x_flat, W, b2d)

    return y, s[0]


# ------------------------------- module forward ------------------------------
def jacobi_angular_reg(x, W, b, *, n=2, p=1, tk_max=1024):
    """(1/B) * sum_ii || (dy/dx)^T v_ii ||_p,  v_ii = e[argsort(y)[:, ii]]."""
    Bsz = x.shape[0]
    x_flat = x.reshape(Bsz, -1)
    C = W.shape[1]
    num_iter = C if n == -1 else n

    y, S = fused_logits_and_colsums(x_flat, W, b, p=p, tk_max=tk_max)

    # TODO(synk): no Pallas sort primitive on TPU; argsort stays as XLA glue.
    # TODO(synk): with a single class tile (tiny C) only one v7x TensorCore is
    # used; splitting the D reduction across cores needs a cross-core combine.
    index = jnp.argsort(-y, axis=1)                 # descending
    top = index[:, :num_iter]                       # (B, num_iter)
    per_proj = jnp.sum(S[top], axis=0)              # sum_b S[c_{b,ii}]
    norms = per_proj ** (1.0 / p)                   # ||Jv_ii||_p
    return jnp.sum(norms) / Bsz


# ------------------------------------ main -----------------------------------
if __name__ == "__main__":
    key = jax.random.PRNGKey(0)
    kx, kw, kb = jax.random.split(key, 3)

    B, Cin, H, Wsp = 2, 4, 16, 16      # x: NCHW
    C = 10                             # number of classes / output dim of y
    D = Cin * H * Wsp                  # 1024

    x = jax.random.normal(kx, (B, Cin, H, Wsp), jnp.float32)
    # deterministic synthetic head parameters (module itself has no weights)
    W = jax.random.normal(kw, (D, C), jnp.float32) * 0.05
    b = jax.random.normal(kb, (C,), jnp.float32) * 0.01

    # pure-JAX reference mirroring torch.autograd.grad semantics for the
    # linear head (Jv = v @ W^T), torch.norm(Jv, p) entrywise p-norm.
    def ref(x, W, b, n, p):
        xf = x.reshape(x.shape[0], -1)
        y = xf @ W + b
        idx = jnp.argsort(-y, axis=1)
        num_iter = y.shape[1] if n == -1 else n
        out = 0.0
        for ii in range(num_iter):
            v = jax.nn.one_hot(idx[:, ii], y.shape[1], dtype=jnp.float32)
            Jv = v @ W.T
            out += jnp.sum(jnp.abs(Jv) ** p) ** (1.0 / p) / x.shape[0]
        return out

    # test 1: default config (n=2, p=1): single K tile, resident x.
    J2 = jax.block_until_ready(jacobi_angular_reg(x, W, b, n=2, p=1))
    r1 = jax.block_until_ready(ref(x, W, b, 2, 1))
    assert jnp.allclose(J2, r1, rtol=1e-5, atol=1e-5), (J2, r1)

    # test 2: exact (n=-1) with p=2, multi-step D reduction (tk=256).
    Jall = jax.block_until_ready(jacobi_angular_reg(x, W, b, n=-1, p=2, tk_max=256))
    r2 = jax.block_until_ready(ref(x, W, b, -1, 2))
    assert jnp.allclose(Jall, r2, rtol=1e-5, atol=1e-5), (Jall, r2)

    # test 3: ragged D (832 not a multiple of tk=384) exercises the in-kernel
    # sublane tail mask; W stays un-padded in HBM, only x gets a small pad.
    x3 = x[:, :, :, :13]                        # D3 = 4*16*13 = 832
    D3 = 4 * 16 * 13
    W3 = W[:D3]
    J3 = jax.block_until_ready(jacobi_angular_reg(x3, W3, b, n=3, p=1, tk_max=384))
    r3 = jax.block_until_ready(ref(x3, W3, b, 3, 1))
    assert jnp.allclose(J3, r3, rtol=1e-5, atol=1e-5), (J3, r3)

    print("KERNEL_OK")
</pallas_src>

<mosaic_0001>
module attributes {stable_mosaic.version = 11 : i64} {
  func.func @_fused_logits_colsum_kernel(%arg0: i32, %arg1: i32, %arg2: memref<2x1024xf32, #tpu.memory_space<vmem>>, %arg3: memref<1024x128xf32, #tpu.memory_space<vmem>>, %arg4: memref<1x128xf32, #tpu.memory_space<vmem>>, %arg5: memref<2x128xf32, #tpu.memory_space<vmem>>, %arg6: memref<1x128xf32, #tpu.memory_space<vmem>>, %arg7: memref<2x128xf32, #tpu.memory_space<vmem>>, %arg8: memref<8x128xf32, #tpu.memory_space<vmem>>) attributes {dimension_semantics = [#tpu.dimension_semantics<parallel>, #tpu.dimension_semantics<arbitrary>], iteration_bounds = array<i64: 1, 1>, scalar_prefetch = 0 : i64, scratch_operands = 2 : i64, tpu.core_type = #tpu.core_type<tc>, window_params = [{pipeline_mode = #tpu.pipeline_mode<synchronous>, transform_indices = @transform_0, window_bounds = array<i64: 2, 1024>}, {transform_indices = @transform_1, window_bounds = array<i64: 1024, 128>}, {transform_indices = @transform_2, window_bounds = array<i64: 1, 128>}, {transform_indices = @transform_3, window_bounds = array<i64: 2, 128>}, {transform_indices = @transform_4, window_bounds = array<i64: 1, 128>}]} {
    %c0_i32 = arith.constant 0 : i32
    %0 = arith.cmpi eq, %arg1, %c0_i32 : i32
    %1 = arith.extui %0 : i1 to i32
    %c0_i32_0 = arith.constant 0 : i32
    %2 = arith.cmpi ne, %1, %c0_i32_0 : i32
    scf.if %2 {
      %cst_14 = arith.constant 0.000000e+00 : f32
      %21 = vector.broadcast %cst_14 : f32 to vector<2x128xf32>
      %c0_15 = arith.constant 0 : index
      %c0_16 = arith.constant 0 : index
      %22 = vector.load %arg7[%c0_15, %c0_16] : memref<2x128xf32, #tpu.memory_space<vmem>>, vector<2x128xf32>
      tpu.vector_store %arg7[%c0_15, %c0_16], %21 {strides = array<i32>} : memref<2x128xf32, #tpu.memory_space<vmem>>, vector<2x128xf32>,
      %cst_17 = arith.constant 0.000000e+00 : f32
      %23 = vector.broadcast %cst_17 : f32 to vector<8x128xf32>
      %c0_18 = arith.constant 0 : index
      %c0_19 = arith.constant 0 : index
      %24 = vector.load %arg8[%c0_18, %c0_19] : memref<8x128xf32, #tpu.memory_space<vmem>>, vector<8x128xf32>
      tpu.vector_store %arg8[%c0_18, %c0_19], %23 {strides = array<i32>} : memref<8x128xf32, #tpu.memory_space<vmem>>, vector<8x128xf32>,
    } else {
    }
    %c0 = arith.constant 0 : index
    %c0_1 = arith.constant 0 : index
    %3 = vector.load %arg3[%c0, %c0_1] : memref<1024x128xf32, #tpu.memory_space<vmem>>, vector<1024x128xf32>
    %c1024_i32 = arith.constant 1024 : i32
    %4 = arith.muli %arg1, %c1024_i32 : i32
    %5 = tpu.assume_multiple %4, 128 : i32
    %c0_2 = arith.constant 0 : index
    %6 = arith.index_cast %5 : i32 to index
    %7 = vector.load %arg2[%c0_2, %6] : memref<2x1024xf32, #tpu.memory_space<vmem>>, vector<2x1024xf32>
    %c0_3 = arith.constant 0 : index
    %c0_4 = arith.constant 0 : index
    %8 = vector.load %arg7[%c0_3, %c0_4] : memref<2x128xf32, #tpu.memory_space<vmem>>, vector<2x128xf32>
    %cst = arith.constant dense<0.000000e+00> : vector<2x128xf32>
    %9 = tpu.matmul %7, %3, %cst {dimension_numbers = #tpu.dot_dimension_numbers<[1], [0], [0], [1], [0, 0, 1, 1], [], []>} : vector<2x1024xf32>, vector<1024x128xf32>, vector<2x128xf32> -> vector<2x128xf32>
    %10 = arith.addf %8, %9 : vector<2x128xf32>
    %c0_5 = arith.constant 0 : index
    %c0_6 = arith.constant 0 : index
    %11 = vector.load %arg7[%c0_5, %c0_6] : memref<2x128xf32, #tpu.memory_space<vmem>>, vector<2x128xf32>
    tpu.vector_store %arg7[%c0_5, %c0_6], %10 {strides = array<i32>} : memref<2x128xf32, #tpu.memory_space<vmem>>, vector<2x128xf32>,
    %12 = math.absf %3 : vector<1024x128xf32>
    %c0_7 = arith.constant 0 : index
    %c0_8 = arith.constant 0 : index
    %13 = vector.load %arg8[%c0_7, %c0_8] : memref<8x128xf32, #tpu.memory_space<vmem>>, vector<8x128xf32>
    %14 = vector.shape_cast %12 : vector<1024x128xf32> to vector<128x8x128xf32>
    %cst_9 = arith.constant dense<0.000000e+00> : vector<8x128xf32>
    %15 = vector.multi_reduction <add>, %14, %cst_9 [0] : vector<128x8x128xf32> to vector<8x128xf32>
    %16 = arith.addf %13, %15 : vector<8x128xf32>
    %c0_10 = arith.constant 0 : index
    %c0_11 = arith.constant 0 : index
    %17 = vector.load %arg8[%c0_10, %c0_11] : memref<8x128xf32, #tpu.memory_space<vmem>>, vector<8x128xf32>
    tpu.vector_store %arg8[%c0_10, %c0_11], %16 {strides = array<i32>} : memref<8x128xf32, #tpu.memory_space<vmem>>, vector<8x128xf32>,
    %c0_i32_12 = arith.constant 0 : i32
    %18 = arith.cmpi eq, %arg1, %c0_i32_12 : i32
    %19 = arith.extui %18 : i1 to i32
    %c0_i32_13 = arith.constant 0 : i32
    %20 = arith.cmpi ne, %19, %c0_i32_13 : i32
    scf.if %20 {
      %c0_14 = arith.constant 0 : index
      %c0_15 = arith.constant 0 : index
      %21 = vector.load %arg7[%c0_14, %c0_15] : memref<2x128xf32, #tpu.memory_space<vmem>>, vector<2x128xf32>
      %c0_16 = arith.constant 0 : index
      %c0_17 = arith.constant 0 : index
      %22 = vector.load %arg4[%c0_16, %c0_17] : memref<1x128xf32, #tpu.memory_space<vmem>>, vector<1x128xf32>
      %23 = vector.broadcast %22 : vector<1x128xf32> to vector<2x128xf32>
      %24 = arith.addf %21, %23 : vector<2x128xf32>
      %c0_18 = arith.constant 0 : index
      %c0_19 = arith.constant 0 : index
      %25 = vector.load %arg5[%c0_18, %c0_19] : memref<2x128xf32, #tpu.memory_space<vmem>>, vector<2x128xf32>
      tpu.vector_store %arg5[%c0_18, %c0_19], %24 {strides = array<i32>} : memref<2x128xf32, #tpu.memory_space<vmem>>, vector<2x128xf32>,
      %c0_20 = arith.constant 0 : index
      %c0_21 = arith.constant 0 : index
      %26 = vector.load %arg8[%c0_20, %c0_21] : memref<8x128xf32, #tpu.memory_space<vmem>>, vector<8x128xf32>
      %cst_22 = arith.constant dense<0.000000e+00> : vector<128xf32>
      %27 = vector.multi_reduction <add>, %26, %cst_22 [0] : vector<8x128xf32> to vector<128xf32>
      %28 = vector.shape_cast %27 : vector<128xf32> to vector<1x128xf32>
      %c0_23 = arith.constant 0 : index
      %c0_24 = arith.constant 0 : index
      %29 = vector.load %arg6[%c0_23, %c0_24] : memref<1x128xf32, #tpu.memory_space<vmem>>, vector<1x128xf32>
      tpu.vector_store %arg6[%c0_23, %c0_24], %28 {strides = array<i32>} : memref<1x128xf32, #tpu.memory_space<vmem>>, vector<1x128xf32>,
    } else {
    }
    return
  }
  func.func @transform_0(%arg0: i32, %arg1: i32) -> (i32, i32) {
    %c0_i32 = arith.constant 0 : i32
    %c0_i32_0 = arith.constant 0 : i32
    %c0_i32_1 = arith.constant 0 : i32
    return %c0_i32, %c0_i32_0 : i32, i32
  }
  func.func @transform_1(%arg0: i32, %arg1: i32) -> (i32, i32) {
    %c0_i32 = arith.constant 0 : i32
    return %arg1, %arg0 : i32, i32
  }
  func.func @transform_2(%arg0: i32, %arg1: i32) -> (i32, i32) {
    %c0_i32 = arith.constant 0 : i32
    %c0_i32_0 = arith.constant 0 : i32
    return %c0_i32, %arg0 : i32, i32
  }
  func.func @transform_3(%arg0: i32, %arg1: i32) -> (i32, i32) {
    %c0_i32 = arith.constant 0 : i32
    %c0_i32_0 = arith.constant 0 : i32
    return %c0_i32, %arg0 : i32, i32
  }
  func.func @transform_4(%arg0: i32, %arg1: i32) -> (i32, i32) {
    %c0_i32 = arith.constant 0 : i32
    %c0_i32_0 = arith.constant 0 : i32
    return %c0_i32, %arg0 : i32, i32
  }
}

</mosaic_0001>

<bundles_post_ra>
// kernel: tpu_custom_call.1
= control target key start
LH: loop header
LB: loop body
LE: loop exit
PB: predicated region body
PF: predicated region fallthrough
CT: control target
= control target key end

     0   :  { %10 = vsyncpa [#allocation5], 0  ;;  %v1118_v62 = vmov 1983009808   ;;  %s2035_s0 = inlined_call_operand.vmem [shape: f32[2,1024], index: 0, kind: input, shape index: {}]   ;;  %s2036_s1 = inlined_call_operand.vmem [shape: f32[1024,10], index: 1, kind: input, shape index: {}]   ;;  %s2037_s2 = inlined_call_operand.vmem [shape: f32[1,10], index: 2, kind: input, shape index: {}]   ;;  %s2038_s3 = inlined_call_operand.hbm [shape: f32[2,10], index: 3, kind: output, shape index: {0}]   ;;  %s2039_s4 = inlined_call_operand.hbm [shape: f32[1,10], index: 4, kind: output, shape index: {1}]  }
   0x1   :  { %v1150_v0 = vld [vmem:[%s2036_s1 + $0x80] sm:$0xff]  ;;  %v1155_v1 = vld [vmem:[%s2036_s1 + $0x88] sm:$0xff]  ;;  %v26_v10 = vld [vmem:[%s2036_s1 + $0x10] sm:$0xff]  ;;  %v164_v63 = vunpack.c.l.s4 %v1118_v62 }
   0x2   :  { %v1160_v2 = vld [vmem:[%s2036_s1 + $0x180] sm:$0xff]  ;;  %v936_v3 = vpack.c.bf16 %v1155_v1, %v1150_v0  ;;  %v1167_v4 = vld [vmem:[%s2036_s1 + $0x188] sm:$0xff]  ;;  %v27_v12 = vld [vmem:[%s2036_s1 + $0x18] sm:$0xff]  ;;  %v488_v13 = vand.u32 2147483647, %v26_v10 }
   0x3   :  { %v24_v5 = vld [vmem:[%s2036_s1] sm:$0xff]  ;;  %v968_v6 = vpack.c.bf16 %v1167_v4, %v1160_v2  ;;  %v25_v7 = vld [vmem:[%s2036_s1 + $0x8] sm:$0xff]  ;;  %v489_v14 = vand.u32 2147483647, %v27_v12  ;;  %v1192_v20 = vld [vmem:[%s2036_s1 + $0x90] sm:$0xff]  ;;  %v942_v27 = vpack.c.bf16 %v27_v12, %v26_v10 }
   0x4   :  { %937 = vmatprep.subr.bf16.mxu0 %v936_v3  ;;  %v938_v8 = vpack.c.bf16 %v25_v7, %v24_v5  ;;  %v486_v9 = vand.u32 2147483647, %v24_v5  ;;  %v487_v11 = vand.u32 2147483647, %v25_v7  ;;  %v28_v16 = vld [vmem:[%s2036_s1 + $0x20] sm:$0xff]  ;;  %v29_v19 = vld [vmem:[%s2036_s1 + $0x28] sm:$0xff]  ;;  %v166_v3 = vlaneseq }
   0x5   :  { %969 = vmatprep.subr.bf16.mxu1 %v968_v6  ;;  %v490_v17 = vand.u32 2147483647, %v28_v16  ;;  %v30_v21 = vld [vmem:[%s2036_s1 + $0x30] sm:$0xff]  ;;  %v491_v22 = vand.u32 2147483647, %v29_v19  ;;  %v1200_v24 = vld [vmem:[%s2036_s1 + $0x98] sm:$0xff]  ;;  %v946_v40 = vpack.c.bf16 %v29_v19, %v28_v16 }
   0x6   :  { %939 = vmatpush3.bf16.msra.mxu0 %v938_v8  ;;  %v615_v15 = vadd.f32 %v487_v11, %v486_v9  ;;  %v1205_v25 = vld [vmem:[%s2036_s1 + $0xa0] sm:$0xff]  ;;  %v1210_v26 = vld [vmem:[%s2036_s1 + $0xa8] sm:$0xff]  ;;  %v492_v28 = vand.u32 2147483647, %v30_v21  ;;  %v940_v30 = vpack.c.bf16 %v1200_v24, %v1192_v20  ;;  %v31_v32 = vld [vmem:[%s2036_s1 + $0x38] sm:$0xff] }
   0x7   :  { %v944_v31 = vpack.c.bf16 %v1210_v26, %v1205_v25  ;;  %v1222_v33 = vld [vmem:[%s2036_s1 + $0xb0] sm:$0xff]  ;;  %v1227_v34 = vld [vmem:[%s2036_s1 + $0xb8] sm:$0xff]  ;;  %v493_v35 = vand.u32 2147483647, %v31_v32  ;;  %v32_v37 = vld [vmem:[%s2036_s1 + $0x40] sm:$0xff]  ;;  %v950_v51 = vpack.c.bf16 %v31_v32, %v30_v21 }
   0x8   :  { %v616_v18 = vadd.f32 %v615_v15, %v488_v13  ;;  %941 = vmatprep.subr.bf16.mxu0 %v940_v30  ;;  %v1235_v38 = vld [vmem:[%s2036_s1 + $0x100] sm:$0xff]  ;;  %v1240_v39 = vld [vmem:[%s2036_s1 + $0x108] sm:$0xff]  ;;  %v494_v41 = vand.u32 2147483647, %v32_v37  ;;  %v948_v44 = vpack.c.bf16 %v1227_v34, %v1222_v33  ;;  %v34_v50 = vld [vmem:[%s2036_s1 + $0x50] sm:$0xff] }
   0x9   :  { %v970_v43 = vpack.c.bf16 %v1240_v39, %v1235_v38  ;;  %v33_v45 = vld [vmem:[%s2036_s1 + $0x48] sm:$0xff]  ;;  %v1252_v46 = vld [vmem:[%s2036_s1 + $0xc0] sm:$0xff]  ;;  %v496_v52 = vand.u32 2147483647, %v34_v50  ;;  %v35_v55 = vld [vmem:[%s2036_s1 + $0x58] sm:$0xff] }
   0xa   :  { %v617_v23 = vadd.f32 %v616_v18, %v489_v14  ;;  %943 = vmatpush3.bf16.msra.mxu0 %v942_v27  ;;  %v1257_v47 = vld [vmem:[%s2036_s1 + $0xc8] sm:$0xff]  ;;  %v495_v48 = vand.u32 2147483647, %v33_v45  ;;  %v1270_v56 = vld [vmem:[%s2036_s1 + $0xd0] sm:$0xff]  ;;  %v1275_v57 = vld [vmem:[%s2036_s1 + $0xd8] sm:$0xff]  ;;  %v954_v61 = vpack.c.bf16 %v33_v45, %v32_v37  ;;  %v165_v27 = vunpack.c.0.s8 %v164_v63 }
   0xb   :  { %945 = vmatprep.subr.bf16.mxu0 %v944_v31  ;;  %971 = vmatpush3.bf16.msra.mxu1 %v970_v43  ;;  %v952_v54 = vpack.c.bf16 %v1257_v47, %v1252_v46  ;;  %v497_v58 = vand.u32 2147483647, %v35_v55  ;;  %v1280_v60 = vld [vmem:[%s2036_s1 + $0x60] sm:$0xff]  ;;  %v1286_v7 = vld [vmem:[%s2036_s1 + $0x110] sm:$0xff]  ;;  %v1291_v8 = vld [vmem:[%s2036_s1 + $0x118] sm:$0xff]  ;;  %v956_v9 = vpack.c.bf16 %v1275_v57, %v1270_v56 }
   0xc   :  { %v618_v29 = vadd.f32 %v617_v23, %v490_v17  ;;  %v498_v5 = vand.u32 2147483647, %v1280_v60  ;;  %v37_v10 = vld [vmem:[%s2036_s1 + $0x68] sm:$0xff]  ;;  %v1301_v11 = vld [vmem:[%s2036_s1 + $0xe0] sm:$0xff]  ;;  %v1311_v13 = vld [vmem:[%s2036_s1 + $0x70] sm:$0xff]  ;;  %v958_v23 = vpack.c.bf16 %v35_v55, %v34_v50 }
   0xd   :  { %v1306_v12 = vld [vmem:[%s2036_s1 + $0xe8] sm:$0xff]  ;;  %v499_v14 = vand.u32 2147483647, %v37_v10  ;;  %v1316_v16 = vld [vmem:[%s2036_s1 + $0x78] sm:$0xff]  ;;  %v1321_v17 = vld [vmem:[%s2036_s1 + $0xf0] sm:$0xff] }
   0xe   :  { %v619_v36 = vadd.f32 %v618_v29, %v491_v22  ;;  %947 = vmatpush3.bf16.msra.mxu0 %v946_v40  ;;  %v1326_v18 = vld [vmem:[%s2036_s1 + $0x120] sm:$0xff]  ;;  %v1331_v19 = vld [vmem:[%s2036_s1 + $0x190] sm:$0xff]  ;;  %v1336_v21 = vld [vmem:[%s2036_s1 + $0x198] sm:$0xff]  ;;  %v974_v22 = vpack.c.bf16 %v1291_v8, %v1286_v7  ;;  %v500_v29 = vand.u32 2147483647, %v1311_v13  ;;  %v960_v37 = vpack.c.bf16 %v1306_v12, %v1301_v11 }
   0xf   :  { %949 = vmatprep.subr.bf16.mxu0 %v948_v44  ;;  %v1344_v31 = vld [vmem:[%s2036_s1 + $0x128] sm:$0xff]  ;;  %v972_v32 = vpack.c.bf16 %v1336_v21, %v1331_v19  ;;  %v1363_v40 = vld [vmem:[%s2036_s1 + $0xf8] sm:$0xff]  ;;  %v501_v44 = vand.u32 2147483647, %v1316_v16  ;;  %v966_v62 = vpack.c.bf16 %v1316_v16, %v1311_v13  ;;  %v157_v63 = vld [vmem:[%s2035_s0] sm:$0xff] }
  0x10   :  { %v620_v42 = vadd.f32 %v619_v36, %v492_v28  ;;  %v167_v28 = vshrl.u32 %v166_v3, 7  ;;  %v1356_v36 = vld [vmem:[%s2036_s1 + $0x1a8] sm:$0xff]  ;;  %v1375_v43 = vld [vmem:[%s2036_s1 + $0x1b8] sm:$0xff]  ;;  %v504_v13 = vand.u32 2147483647, %v1192_v20  ;;  %v1446_v20 = vld [vmem:[%s2036_s1 + $0x200] sm:$0xff] }
  0x11   :  { %973 = vmatprep.subr.bf16.mxu1 %v972_v32  ;;  %v1438_v16 = vld [vmem:[%s2036_s1 + $0x1d8] sm:$0xff] }
  0x12   :  { %v621_v49 = vadd.f32 %v620_v42, %v493_v35  ;;  %951 = vmatpush3.bf16.msra.mxu0 %v950_v51  ;;  %v1351_v35 = vld [vmem:[%s2036_s1 + $0x1a0] sm:$0xff]  ;;  %v1370_v42 = vld [vmem:[%s2036_s1 + $0x1b0] sm:$0xff]  ;;  %975 = vmatpush3.bf16.msra.mxu1 %v974_v22  ;;  %v1381_v50 = vsub.s32 %v165_v27, %v167_v28  ;;  %v502_v51 = vand.u32 2147483647, %v1150_v0  ;;  %v1451_v27 = vld [vmem:[%s2036_s1 + $0x208] sm:$0xff] }
  0x13   :  { %953 = vmatprep.subr.bf16.mxu0 %v952_v54  ;;  %v1392_v54 = vld [vmem:[%s2036_s1 + $0x138] sm:$0xff]  ;;  %v980_v55 = vpack.c.bf16 %v1375_v43, %v1370_v42  ;;  %v1401_v0 = vld [vmem:[%s2036_s1 + $0x1c0] sm:$0xff] }
  0x14   :  { %v622_v53 = vadd.f32 %v621_v49, %v494_v41  ;;  %v976_v41 = vpack.c.bf16 %v1356_v36, %v1351_v35  ;;  %v962_v49 = vpack.c.bf16 %v37_v10, %v1280_v60  ;;  %v503_v60 = vand.u32 2147483647, %v1155_v1  ;;  %v1420_v1 = vld [vmem:[%s2036_s1 + $0x140] sm:$0xff]  ;;  %v1425_v10 = vld [vmem:[%s2036_s1 + $0x148] sm:$0xff] }
  0x15   :  { %v986_v32 = vpack.c.bf16 %v1425_v10, %v1420_v1 }
  0x16   :  { %v623_v59 = vadd.f32 %v622_v53, %v495_v48  ;;  %955 = vmatpush3.bf16.msra.mxu0 %v954_v61  ;;  %v978_v48 = vpack.c.bf16 %v1344_v31, %v1326_v18  ;;  %v1387_v53 = vld [vmem:[%s2036_s1 + $0x130] sm:$0xff]  ;;  %977 = vmatprep.subr.bf16.mxu1 %v976_v41  ;;  %v1466_v41 = vld [vmem:[%s2036_s1 + $0x158] sm:$0xff] }
  0x17   :  { %957 = vmatprep.subr.bf16.mxu0 %v956_v9  ;;  %v982_v3 = vpack.c.bf16 %v1392_v54, %v1387_v53 }
  0x18   :  { %v624_v6 = vadd.f32 %v623_v59, %v496_v52  ;;  %v1406_v59 = vld [vmem:[%s2036_s1 + $0x1c8] sm:$0xff]  ;;  %979 = vmatpush3.bf16.msra.mxu1 %v978_v48  ;;  %v1474_v48 = vld [vmem:[%s2036_s1 + $0x280] sm:$0xff] }
  0x19   :  { %981 = vmatprep.subr.bf16.mxu1 %v980_v55  ;;  %2080 = vst [vmem:[#allocation10_spill] sm:$0xff] %v1474_v48 }
  0x1a   :  { %v625_v15 = vadd.f32 %v624_v6, %v497_v58  ;;  %959 = vmatpush3.bf16.msra.mxu0 %v958_v23  ;;  %v964_v58 = vpack.c.bf16 %v1363_v40, %v1321_v17  ;;  %v162_v6 = vcombine.high %v157_v63, %v157_v63 }
  0x1b   :  { %961 = vmatprep.subr.bf16.mxu0 %v960_v37 }
  0x1c   :  { %v626_v30 = vadd.f32 %v625_v15, %v498_v5  ;;  %v169_v5 = vrot.slane %v157_v63, %v1381_v50  ;;  %v1433_v15 = vld [vmem:[%s2036_s1 + $0x1d0] sm:$0xff]  ;;  %v1441_v23 = vrot.slane %v162_v6, %v1381_v50  ;;  %983 = vmatpush3.bf16.msra.mxu1 %v982_v3  ;;  %v1506_v63 = vld [vmem:[%s2036_s1 + $0x218] sm:$0xff]  ;;  %v1516_v3 = vld [vmem:[%s2036_s1 + $0x168] sm:$0xff] }
  0x1e   :  { %v627_v45 = vadd.f32 %v626_v30, %v499_v14  ;;  %963 = vmatpush3.bf16.msra.mxu0 %v962_v49  ;;  %v984_v14 = vpack.c.bf16 %v1406_v59, %v1401_v0  ;;  %v177_v22 = vcombine.high %v169_v5, %v169_v5  ;;  %v1457_v30 = vld [vmem:[%s2036_s1 + $0x150] sm:$0xff]  ;;  %v178_v37 = vcombine.high %v1441_v23, %v1441_v23  ;;  %v1479_v49 = vld [vmem:[%s2036_s1 + $0x288] sm:$0xff] }
  0x1f   :  { %965 = vmatprep.subr.bf16.mxu0 %v964_v58  ;;  %2081 = vst [vmem:[#allocation11_spill] sm:$0xff] %v1479_v49  ;;  %v1000_v55 = vpack.c.bf16 %v1479_v49, %v1474_v48  ;;  %v507_v58 = vand.u32 2147483647, %v1210_v26  ;;  %v1511_v26 = vld [vmem:[%s2036_s1 + $0x160] sm:$0xff]  ;;  %v1601_v49 = vld [vmem:[%s2036_s1 + $0x230] sm:$0xff] }
  0x20   :  { %v628_v52 = vadd.f32 %v627_v45, %v500_v29  ;;  %v505_v29 = vand.u32 2147483647, %v1200_v24  ;;  %v506_v24 = vand.u32 2147483647, %v1205_v25  ;;  %985 = vmatprep.subr.bf16.mxu1 %v984_v14  ;;  %v988_v45 = vpack.c.bf16 %v1438_v16, %v1433_v15  ;;  %268 = vmatprep.mubr.f32.mxu0 %v177_v22  ;;  %v1486_v25 = vld [vmem:[%s2036_s1 + $0x1e0] sm:$0xff]  ;;  %v1529_v14 = vld [vmem:[%s2036_s1 + $0x1f8] sm:$0xff] }
  0x21   :  { %338 = vmatprep.mubr.f32.mxu1 %v178_v37  ;;  %987 = vmatpush3.bf16.msra.mxu1 %v986_v32  ;;  %v509_v22 = vand.u32 2147483647, %v1227_v34  ;;  %v994_v37 = vpack.c.bf16 %v1516_v3, %v1511_v26  ;;  %v1549_v34 = vld [vmem:[%s2036_s1 + $0x220] sm:$0xff] }
  0x22   :  { %v629_v61 = vadd.f32 %v628_v52, %v501_v44  ;;  %967 = vmatpush3.bf16.msra.mxu0 %v966_v62  ;;  %v1491_v52 = vld [vmem:[%s2036_s1 + $0x1e8] sm:$0xff]  ;;  %v1501_v62 = vld [vmem:[%s2036_s1 + $0x210] sm:$0xff]  ;;  %989 = vmatprep.subr.bf16.mxu1 %v988_v45 }
  0x23   :  { %1001 = vmatprep.subr.bf16.mxu0 %v1000_v55  ;;  %v1006_v32 = vpack.c.bf16 %v1506_v63, %v1501_v62  ;;  %v1561_v45 = vld [vmem:[%s2036_s1 + $0x170] sm:$0xff]  ;;  %v510_v55 = vand.u32 2147483647, %v1252_v46  ;;  %v1584_v46 = vld [vmem:[%s2036_s1 + $0x2a0] sm:$0xff] }
  0x24   :  { %v630_v9 = vadd.f32 %v629_v61, %v502_v51  ;;  %v1002_v51 = vpack.c.bf16 %v1451_v27, %v1446_v20  ;;  %v990_v61 = vpack.c.bf16 %v1466_v41, %v1457_v30  ;;  %2087 = vst [vmem:[#allocation17_spill] sm:$0xff] %v1584_v46 }
  0x25   :  { %269 = vmatmul.mubr.f32.vlgmr.msra.gmra.mrb[0].mxu0 %v169_v5  ;;  %v508_v5 = vand.u32 2147483647, %v1222_v33  ;;  %v1535_v33 = vld [vmem:[%s2036_s1 + $0x290] sm:$0xff] }
  0x26   :  { %v631_v28 = vadd.f32 %v630_v9, %v503_v60  ;;  %v992_v9 = vpack.c.bf16 %v1491_v52, %v1486_v25  ;;  %1003 = vmatpush3.bf16.msra.mxu0 %v1002_v51  ;;  %2082 = vst [vmem:[#allocation12_spill] sm:$0xff] %v1535_v33  ;;  %991 = vmatpush3.bf16.msra.mxu1 %v990_v61  ;;  %v1566_v51 = vld [vmem:[%s2036_s1 + $0x178] sm:$0xff]  ;;  %v1574_v61 = vld [vmem:[%s2036_s1 + $0x380] sm:$0xff] }
  0x27   :  { %2085 = vst [vmem:[#allocation15_spill] sm:$0xff] %v1574_v61 }
  0x28   :  { %v632_v44 = vadd.f32 %v631_v28, %v504_v13  ;;  %v1524_v13 = vld [vmem:[%s2036_s1 + $0x1f0] sm:$0xff]  ;;  %993 = vmatprep.subr.bf16.mxu1 %v992_v9  ;;  %v511_v9 = vand.u32 2147483647, %v1257_v47  ;;  %v1606_v47 = vld [vmem:[%s2036_s1 + $0x238] sm:$0xff] }
  0x29   :  { %v1014_v48 = vpack.c.bf16 %v1606_v47, %v1601_v49 }
  0x2a   :  { %v633_v60 = vadd.f32 %v632_v44, %v505_v29  ;;  %v1540_v29 = vld [vmem:[%s2036_s1 + $0x298] sm:$0xff]  ;;  %995 = vmatpush3.bf16.msra.mxu1 %v994_v37 }
  0x2b   :  { %2083 = vst [vmem:[#allocation13_spill] sm:$0xff] %v1540_v29  ;;  %v1004_v44 = vpack.c.bf16 %v1540_v29, %v1535_v33  ;;  %v998_v33 = vpack.c.bf16 %v1566_v51, %v1561_v45 }
  0x2c   :  { %v634_v6 = vadd.f32 %v633_v60, %v506_v24  ;;  %v1554_v24 = vld [vmem:[%s2036_s1 + $0x228] sm:$0xff]  ;;  %v996_v60 = vpack.c.bf16 %v1529_v14, %v1524_v13 }
  0x2d   :  { %2084 = vst [vmem:[#allocation14_spill] sm:$0xff] %v1554_v24  ;;  %1005 = vmatprep.subr.bf16.mxu0 %v1004_v44  ;;  %v1010_v44 = vpack.c.bf16 %v1554_v24, %v1549_v34  ;;  %v1654_v24 = vld [vmem:[%s2036_s1 + $0x248] sm:$0xff] }
  0x2e   :  { %v635_v28 = vadd.f32 %v634_v6, %v507_v58  ;;  %v1579_v6 = vld [vmem:[%s2036_s1 + $0x388] sm:$0xff]  ;;  %1007 = vmatpush3.bf16.msra.mxu0 %v1006_v32  ;;  %v512_v32 = vand.u32 2147483647, %v1270_v56  ;;  %997 = vmatprep.subr.bf16.mxu1 %v996_v60  ;;  %v1629_v56 = vld [vmem:[%s2036_s1 + $0x2b8] sm:$0xff]  ;;  %2095 = vst [vmem:[#allocation25_spill] sm:$0xff] %v1654_v24 }
  0x2f   :  { %2086 = vst [vmem:[#allocation16_spill] sm:$0xff] %v1579_v6  ;;  %2092 = vst [vmem:[#allocation22_spill] sm:$0xff] %v1629_v56  ;;  %v1639_v60 = vld [vmem:[%s2036_s1 + $0x398] sm:$0xff]  ;;  %999 = vmatpush3.bf16.msra.mxu1 %v998_v33  ;;  %v514_v33 = vand.u32 2147483647, %v1301_v11  ;;  %v1686_v11 = vld [vmem:[%s2036_s1 + $0x3a0] sm:$0xff] }
  0x30   :  { %v636_v58 = vadd.f32 %v635_v28, %v508_v5  ;;  %v1589_v5 = vld [vmem:[%s2036_s1 + $0x2a8] sm:$0xff]  ;;  %2094 = vst [vmem:[#allocation24_spill] sm:$0xff] %v1639_v60  ;;  %2100 = vst [vmem:[#allocation30_spill] sm:$0xff] %v1686_v11 }
  0x31   :  { %2088 = vst [vmem:[#allocation18_spill] sm:$0xff] %v1589_v5  ;;  %v1008_v29 = vpack.c.bf16 %v1589_v5, %v1584_v46  ;;  %v1619_v5 = vld [vmem:[%s2036_s1 + $0x308] sm:$0xff]  ;;  %v1624_v46 = vld [vmem:[%s2036_s1 + $0x2b0] sm:$0xff] }
  0x32   :  { %v637_v28 = vadd.f32 %v636_v58, %v509_v22  ;;  %v1611_v22 = vld [vmem:[%s2036_s1 + $0x300] sm:$0xff]  ;;  %v1032_v58 = vpack.c.bf16 %v1579_v6, %v1574_v61  ;;  %2090 = vst [vmem:[#allocation20_spill] sm:$0xff] %v1619_v5  ;;  %2091 = vst [vmem:[#allocation21_spill] sm:$0xff] %v1624_v46  ;;  %339 = vmatmul.mubr.f32.vlgmr.msra.gmra.mrb[0].mxu1 %v1441_v23  ;;  %v1715_v23 = vld [vmem:[%s2036_s1 + $0x258] sm:$0xff] }
  0x33   :  { %2089 = vst [vmem:[#allocation19_spill] sm:$0xff] %v1611_v22  ;;  %1009 = vmatprep.subr.bf16.mxu0 %v1008_v29  ;;  %v1012_v29 = vpack.c.bf16 %v1629_v56, %v1624_v46  ;;  %v1647_v61 = vld [vmem:[%s2036_s1 + $0x240] sm:$0xff]  ;;  %v1034_v56 = vpack.c.bf16 %v1619_v5, %v1611_v22  ;;  %v1679_v5 = vld [vmem:[%s2036_s1 + $0x318] sm:$0xff] }
  0x34   :  { %v638_v37 = vadd.f32 %v637_v28, %v510_v55  ;;  %v1634_v55 = vld [vmem:[%s2036_s1 + $0x390] sm:$0xff]  ;;  %v513_v28 = vand.u32 2147483647, %v1275_v57  ;;  %1011 = vmatpush3.bf16.msra.mxu0 %v1010_v44  ;;  %v1661_v57 = vld [vmem:[%s2036_s1 + $0x2c0] sm:$0xff]  ;;  %1033 = vmatprep.subr.bf16.mxu1 %v1032_v58  ;;  %2099 = vst [vmem:[#allocation29_spill] sm:$0xff] %v1679_v5 }
  0x35   :  { %2093 = vst [vmem:[#allocation23_spill] sm:$0xff] %v1634_v55  ;;  %1013 = vmatprep.subr.bf16.mxu0 %v1012_v29  ;;  %2096 = vst [vmem:[#allocation26_spill] sm:$0xff] %v1661_v57  ;;  %v1674_v29 = vld [vmem:[%s2036_s1 + $0x310] sm:$0xff]  ;;  %1035 = vmatpush3.bf16.msra.mxu1 %v1034_v56  ;;  %v1732_v56 = vld [vmem:[%s2036_s1 + $0x328] sm:$0xff] }
  0x36   :  { %v639_v6 = vadd.f32 %v638_v37, %v511_v9  ;;  %v1666_v9 = vld [vmem:[%s2036_s1 + $0x2c8] sm:$0xff]  ;;  %v1036_v37 = vpack.c.bf16 %v1639_v60, %v1634_v55  ;;  %2098 = vst [vmem:[#allocation28_spill] sm:$0xff] %v1674_v29  ;;  %v1018_v60 = vpack.c.bf16 %v1654_v24, %v1647_v61  ;;  %v1700_v55 = vld [vmem:[%s2036_s1 + $0x2d0] sm:$0xff]  ;;  %v1727_v24 = vld [vmem:[%s2036_s1 + $0x320] sm:$0xff] }
  0x37   :  { %2097 = vst [vmem:[#allocation27_spill] sm:$0xff] %v1666_v9  ;;  %v1016_v22 = vpack.c.bf16 %v1666_v9, %v1661_v57  ;;  %2102 = vst [vmem:[#allocation32_spill] sm:$0xff] %v1700_v55  ;;  %v1705_v9 = vld [vmem:[%s2036_s1 + $0x2d8] sm:$0xff] }
  0x38   :  { %v640_v44 = vadd.f32 %v639_v6, %v512_v32  ;;  %v1691_v6 = vld [vmem:[%s2036_s1 + $0x3a8] sm:$0xff]  ;;  %v515_v32 = vand.u32 2147483647, %v1306_v12  ;;  %1015 = vmatpush3.bf16.msra.mxu0 %v1014_v48  ;;  %2103 = vst [vmem:[#allocation33_spill] sm:$0xff] %v1705_v9  ;;  %v1710_v12 = vld [vmem:[%s2036_s1 + $0x250] sm:$0xff]  ;;  %v1038_v48 = vpack.c.bf16 %v1679_v5, %v1674_v29  ;;  %1037 = vmatprep.subr.bf16.mxu1 %v1036_v37  ;;  %2104 = vst [vmem:[#allocation34_spill] sm:$0xff] %v1727_v24 }
  0x39   :  { %2101 = vst [vmem:[#allocation31_spill] sm:$0xff] %v1691_v6  ;;  %1017 = vmatprep.subr.bf16.mxu0 %v1016_v22  ;;  %v1040_v46 = vpack.c.bf16 %v1691_v6, %v1686_v11  ;;  %2105 = vst [vmem:[#allocation35_spill] sm:$0xff] %v1732_v56  ;;  %v1737_v22 = vld [vmem:[%s2036_s1 + $0x3b0] sm:$0xff]  ;;  %v1752_v37 = vld [vmem:[%s2036_s1 + $0x2e8] sm:$0xff]  ;;  %v1022_v5 = vpack.c.bf16 %v1715_v23, %v1710_v12 }
  0x3a   :  { %v641_v58 = vadd.f32 %v640_v44, %v513_v28  ;;  %v1020_v28 = vpack.c.bf16 %v1705_v9, %v1700_v55  ;;  %v516_v44 = vand.u32 2147483647, %v1321_v17  ;;  %2106 = vst [vmem:[#allocation36_spill] sm:$0xff] %v1737_v22  ;;  %v1742_v17 = vld [vmem:[%s2036_s1 + $0x3b8] sm:$0xff]  ;;  %2109 = vst [vmem:[#allocation39_spill] sm:$0xff] %v1752_v37  ;;  %v1758_v11 = vld [vmem:[%s2036_s1 + $0x260] sm:$0xff]  ;;  %1039 = vmatpush3.bf16.msra.mxu1 %v1038_v48 }
  0x3b   :  { %2107 = vst [vmem:[#allocation37_spill] sm:$0xff] %v1742_v17  ;;  %2110 = vst [vmem:[#allocation40_spill] sm:$0xff] %v1758_v11  ;;  %v1765_v29 = vld [vmem:[%s2036_s1 + $0x268] sm:$0xff]  ;;  %v1042_v9 = vpack.c.bf16 %v1732_v56, %v1727_v24  ;;  %1041 = vmatprep.subr.bf16.mxu1 %v1040_v46  ;;  %v1044_v56 = vpack.c.bf16 %v1742_v17, %v1737_v22  ;;  %v1787_v24 = vld [vmem:[%s2036_s1 + $0x2f0] sm:$0xff]  ;;  %v519_v46 = vand.u32 2147483647, %v1240_v39 }
  0x3c   :  { %v642_v57 = vadd.f32 %v641_v58, %v514_v33  ;;  %v1747_v33 = vld [vmem:[%s2036_s1 + $0x2e0] sm:$0xff]  ;;  %v517_v58 = vand.u32 2147483647, %v1363_v40  ;;  %1019 = vmatpush3.bf16.msra.mxu0 %v1018_v60  ;;  %2111 = vst [vmem:[#allocation41_spill] sm:$0xff] %v1765_v29  ;;  %v1772_v40 = vld [vmem:[%s2036_s1 + $0x330] sm:$0xff]  ;;  %v1777_v60 = vld [vmem:[%s2036_s1 + $0x338] sm:$0xff]  ;;  %v1026_v17 = vpack.c.bf16 %v1765_v29, %v1758_v11 }
  0x3d   :  { %2108 = vst [vmem:[#allocation38_spill] sm:$0xff] %v1747_v33  ;;  %2112 = vst [vmem:[#allocation42_spill] sm:$0xff] %v1772_v40  ;;  %1021 = vmatprep.subr.bf16.mxu0 %v1020_v28  ;;  %v1792_v55 = vld [vmem:[%s2036_s1 + $0x2f8] sm:$0xff]  ;;  %v1797_v28 = vld [vmem:[%s2036_s1 + $0x3c0] sm:$0xff] }
  0x3e   :  { %v643_v6 = vadd.f32 %v642_v57, %v515_v32  ;;  %2113 = vst [vmem:[#allocation43_spill] sm:$0xff] %v1777_v60  ;;  %v1024_v57 = vpack.c.bf16 %v1752_v37, %v1747_v33  ;;  %v518_v32 = vand.u32 2147483647, %v1235_v38  ;;  %2114 = vst [vmem:[#allocation44_spill] sm:$0xff] %v1787_v24  ;;  %v1802_v38 = vld [vmem:[%s2036_s1 + $0x3c8] sm:$0xff]  ;;  %v1815_v37 = vld [vmem:[%s2036_s1 + $0x270] sm:$0xff]  ;;  %1043 = vmatpush3.bf16.msra.mxu1 %v1042_v9 }
  0x3f   :  { %2115 = vst [vmem:[#allocation45_spill] sm:$0xff] %v1792_v55  ;;  %2116 = vst [vmem:[#allocation46_spill] sm:$0xff] %v1797_v28  ;;  %v158_v22 = vld [vmem:[%s2035_s0 + $0x8] sm:$0xff]  ;;  %v1820_v39 = vld [vmem:[%s2036_s1 + $0x278] sm:$0xff] }
  0x40   :  { %v644_v48 = vadd.f32 %v643_v6, %v516_v44  ;;  %2117 = vst [vmem:[#allocation47_spill] sm:$0xff] %v1802_v38  ;;  %v1046_v44 = vpack.c.bf16 %v1777_v60, %v1772_v40  ;;  %1023 = vmatpush3.bf16.msra.mxu0 %v1022_v5  ;;  %v1028_v5 = vpack.c.bf16 %v1792_v55, %v1787_v24 }
  0x41   :  { %1025 = vmatprep.subr.bf16.mxu0 %v1024_v57 }
  0x42   :  { %v645_v6 = vadd.f32 %v644_v48, %v517_v58  ;;  %v186_v58 = vrot.slane %v158_v22, %v1381_v50  ;;  %v179_v48 = vcombine.high %v158_v22, %v158_v22 }
  0x43   :  { %11 = vsyncpa [#allocation7], 0  ;;  %v520_v60 = vand.u32 2147483647, %v1286_v7  ;;  %1045 = vmatprep.subr.bf16.mxu1 %v1044_v56  ;;  %v1048_v33 = vpack.c.bf16 %v1802_v38, %v1797_v28  ;;  %v1831_v29 = vld [vmem:[%s2036_s1 + $0x340] sm:$0xff]  ;;  %v1836_v9 = vld [vmem:[%s2036_s1 + $0x348] sm:$0xff]  ;;  %v1030_v38 = vpack.c.bf16 %v1820_v39, %v1815_v37 }
  0x44   :  { %v646_v40 = vadd.f32 %v645_v6, %v518_v32  ;;  %v1841_v22 = vld [vmem:[%s2036_s1 + $0x3d0] sm:$0xff]  ;;  %v1846_v7 = vld [vmem:[%s2036_s1 + $0x3d8] sm:$0xff]  ;;  %v194_v56 = vcombine.high %v186_v58, %v186_v58  ;;  %v193_v57 = vrot.slane %v179_v48, %v1381_v50  ;;  %v521_v32 = vand.u32 2147483647, %v1291_v8  ;;  %1027 = vmatpush3.bf16.msra.mxu0 %v1026_v17  ;;  %1047 = vmatpush3.bf16.msra.mxu1 %v1046_v44 }
  0x45   :  { %v1050_v28 = vpack.c.bf16 %v1836_v9, %v1831_v29  ;;  %1029 = vmatprep.subr.bf16.mxu0 %v1028_v5  ;;  %v522_v24 = vand.u32 2147483647, %v1326_v18  ;;  %1049 = vmatprep.subr.bf16.mxu1 %v1048_v33  ;;  %v1052_v50 = vpack.c.bf16 %v1846_v7, %v1841_v22  ;;  %v1860_v8 = vld [vmem:[%s2036_s1 + $0x350] sm:$0xff]  ;;  %v1865_v17 = vld [vmem:[%s2036_s1 + $0x358] sm:$0xff]  ;;  %v1870_v18 = vld [vmem:[%s2036_s1 + $0x3e0] sm:$0xff] }
  0x46   :  { %v647_v6 = vadd.f32 %v646_v40, %v519_v46  ;;  %v195_v55 = vcombine.high %v193_v57, %v193_v57  ;;  %408 = vmatprep.mubr.f32.mxu0 %v194_v56  ;;  %v1875_v33 = vld [vmem:[%s2036_s1 + $0x3e8] sm:$0xff]  ;;  %v523_v40 = vand.u32 2147483647, %v1344_v31  ;;  %v1054_v46 = vpack.c.bf16 %v1865_v17, %v1860_v8  ;;  %v1886_v56 = vld [vmem:[%s2036_s1 + $0x360] sm:$0xff] }
  0x47   :  { %v524_v44 = vand.u32 2147483647, %v1387_v53  ;;  %v1056_v48 = vpack.c.bf16 %v1875_v33, %v1870_v18  ;;  %v1891_v31 = vld [vmem:[%s2036_s1 + $0x368] sm:$0xff]  ;;  %v1901_v53 = vld [vmem:[%s2036_s1 + $0x3f8] sm:$0xff] }
  0x48   :  { %v648_v11 = vadd.f32 %v647_v6, %v520_v60  ;;  %478 = vmatprep.mubr.f32.mxu1 %v195_v55  ;;  %1031 = vmatpush3.bf16.msra.mxu0 %v1030_v38  ;;  %v1896_v55 = vld [vmem:[%s2036_s1 + $0x3f0] sm:$0xff]  ;;  %2119 = vst [vmem:[#allocation49_spill] sm:$0xff] %v1901_v53  ;;  %v526_v38 = vand.u32 2147483647, %v1420_v1 }
  0x49   :  { %1051 = vmatpush3.bf16.msra.mxu1 %v1050_v28  ;;  %2118 = vst [vmem:[#allocation48_spill] sm:$0xff] %v1896_v55  ;;  %v1058_v28 = vpack.c.bf16 %v1891_v31, %v1886_v56  ;;  %v1910_v6 = vld [vmem:[%s2036_s1 + $0x370] sm:$0xff] }
  0x4a   :  { %v649_v60 = vadd.f32 %v648_v11, %v521_v32  ;;  %1053 = vmatprep.subr.bf16.mxu1 %v1052_v50  ;;  %v527_v50 = vand.u32 2147483647, %v1425_v10  ;;  %v532_v10 = vand.u32 2147483647, %v1561_v45 }
  0x4b   :  { %409 = vmatmul.mubr.f32.vlgmr.msra.gmra.mrb[2].mxu0 %v186_v58  ;;  %v1915_v58 = vld [vmem:[%s2036_s1 + $0x378] sm:$0xff]  ;;  %s1120_s1 = smov [#allocation6]  }
  0x4c   :  { %v650_v5 = vadd.f32 %v649_v60, %v522_v24  ;;  %v525_v24 = vand.u32 2147483647, %v1392_v54  ;;  %v1060_v54 = vpack.c.bf16 %v1901_v53, %v1896_v55  ;;  %v1062_v1 = vpack.c.bf16 %v1915_v58, %v1910_v6  ;;  %s781_s13 = sshll.u32 %s1120_s1, 4  ;;  %s782_s13 = int_to_ptr.vmem [resolvable:$true] %s781_s13 }
  0x4d   :  { %1055 = vmatpush3.bf16.msra.mxu1 %v1054_v46  ;;  %v528_v60 = vand.u32 2147483647, %v1457_v30  ;;  %v531_v53 = vand.u32 2147483647, %v1516_v3  ;;  %v534_v30 = vand.u32 2147483647, %v1160_v2  ;;  %p1075_p1 = scmp.lt.s32.totalorder %s782_s13, %s782_s13 }
  0x4e   :  { %v651_v11 = vadd.f32 %v650_v5, %v523_v40  ;;  %1057 = vmatprep.subr.bf16.mxu1 %v1056_v48  ;;  %v530_v48 = vand.u32 2147483647, %v1511_v26  ;;  %v536_v26 = vand.u32 2147483647, %v1331_v19  ;;  %v537_v3 = vand.u32 2147483647, %v1336_v21 }
  0x4f   :  { %v543_v19 = vand.u32 2147483647, %v1406_v59  ;;  %v544_v21 = vand.u32 2147483647, %v1433_v15  ;;  %v550_v59 = vand.u32 2147483647, %v1446_v20 }
  0x50   :  { %v652_v32 = vadd.f32 %v651_v11, %v524_v44  ;;  %v529_v44 = vand.u32 2147483647, %v1466_v41  ;;  %v535_v41 = vand.u32 2147483647, %v1167_v4  ;;  %v551_v15 = vand.u32 2147483647, %v1451_v27 }
  0x51   :  { %1059 = vmatpush3.bf16.msra.mxu1 %v1058_v28  ;;  %v533_v28 = vand.u32 2147483647, %v1566_v51  ;;  %v557_v20 = vand.u32 2147483647, %v1606_v47  ;;  %v558_v27 = vand.u32 2147483647, %v1647_v61 }
  0x52   :  { %v653_v40 = vadd.f32 %v652_v32, %v525_v24  ;;  %1061 = vmatprep.subr.bf16.mxu1 %v1060_v54  ;;  %v564_v47 = vand.u32 2147483647, %v1815_v37  ;;  %v565_v61 = vand.u32 2147483647, %v1820_v39  ;;  %s1070_s14 = scalar_lea.vmem %s782_s13, 16  ;;  %s1074_s15 = scalar_lea.vmem %s782_s13, 32 }
  0x53   :  { %p1071_p0 = scmp.ne.s32.totalorder %s782_s13, %s1070_s14  ;;  %p1076_p2 = scmp.lt.s32.totalorder %s1074_s15, %s1070_s14 }
  0x54   :  { %v654_v46 = vadd.f32 %v653_v40, %v526_v38 }
  0x55   :  { %1063 = vmatpush3.bf16.msra.mxu1 %v1062_v1  ;;  %p1077_p3 = por %p1076_p2, %p1075_p1 }
  0x56   :  { %v655_v5 = vadd.f32 %v654_v46, %v527_v50  ;;  %v542_v46 = vand.u32 2147483647, %v1401_v0  ;;  %v549_v0 = vand.u32 2147483647, %v1529_v14  ;;  %v556_v14 = vand.u32 2147483647, %v1601_v49 }
  0x57   :  { %v2123_v49 = vld [vmem:[#allocation41_spill] sm:$0xff]  ;;  %p1078_p4 = pnand %p1077_p3, %p1071_p0 }
  0x58   :  { %v656_v11 = vadd.f32 %v655_v5, %v528_v60  ;;  %479 = vmatmul.mubr.f32.vlgmr.msra.gmra.mrb[2].mxu1 %v193_v57  ;;  %v538_v57 = vand.u32 2147483647, %v1351_v35  ;;  %v541_v60 = vand.u32 2147483647, %v1375_v43  ;;  %v545_v35 = vand.u32 2147483647, %v1438_v16 }
  0x59   :  { %v548_v43 = vand.u32 2147483647, %v1524_v13  ;;  %v552_v16 = vand.u32 2147483647, %v1501_v62  ;;  %v2121_v62 = vld [vmem:[#allocation25_spill] sm:$0xff] }
  0x5a   :  { %v657_v55 = vadd.f32 %v656_v11, %v529_v44 }
  0x5c   :  { %v658_v24 = vadd.f32 %v657_v55, %v530_v48  ;;  %v539_v55 = vand.u32 2147483647, %v1356_v36  ;;  %v546_v36 = vand.u32 2147483647, %v1486_v25  ;;  %v553_v25 = vand.u32 2147483647, %v1506_v63 }
  0x5d   :  { %v560_v63 = vand.u32 2147483647, %v1710_v12  ;;  %v2125_v12 = vld [vmem:[#allocation11_spill] sm:$0xff] }
  0x5e   :  { %v659_v32 = vadd.f32 %v658_v24, %v531_v53  ;;  %v540_v53 = vand.u32 2147483647, %v1370_v42  ;;  %v547_v42 = vand.u32 2147483647, %v1491_v52  ;;  %v554_v52 = vand.u32 2147483647, %v1549_v34 }
  0x5f   :  { %v561_v34 = vand.u32 2147483647, %v1715_v23 }
  0x60   :  { %v660_v38 = vadd.f32 %v659_v32, %v532_v10 }
  0x62   :  { %v661_v54 = vadd.f32 %v660_v38, %v533_v28 }
  0x64   :  { %v662_v50 = vadd.f32 %v661_v54, %v534_v30 }
  0x66   :  { %v663_v40 = vadd.f32 %v662_v50, %v535_v41  ;;  %v2120_v50 = vld [vmem:[#allocation14_spill] sm:$0xff] }
  0x67   :  { %v555_v13 = vand.u32 2147483647, %v2120_v50  ;;  %v2132_v50 = vld [vmem:[#allocation26_spill] sm:$0xff] }
  0x68   :  { %v664_v1 = vadd.f32 %v663_v40, %v536_v26 }
  0x6a   :  { %v665_v45 = vadd.f32 %v664_v1, %v537_v3 }
  0x6c   :  { %v666_v51 = vadd.f32 %v665_v45, %v538_v57  ;;  %v559_v57 = vand.u32 2147483647, %v2121_v62  ;;  %v2135_v62 = vld [vmem:[#allocation33_spill] sm:$0xff] }
  0x6e   :  { %v667_v2 = vadd.f32 %v666_v51, %v539_v55 }
  0x70   :  { %v668_v4 = vadd.f32 %v667_v2, %v540_v53  ;;  %v2122_v53 = vld [vmem:[#allocation40_spill] sm:$0xff] }
  0x71   :  { %v562_v2 = vand.u32 2147483647, %v2122_v53 }
  0x72   :  { %v669_v44 = vadd.f32 %v668_v4, %v541_v60  ;;  %v563_v4 = vand.u32 2147483647, %v2123_v49 }
  0x74   :  { %v670_v5 = vadd.f32 %v669_v44, %v542_v46 }
  0x76   :  { %v671_v48 = vadd.f32 %v670_v5, %v543_v19  ;;  %v2124_v5 = vld [vmem:[#allocation10_spill] sm:$0xff] }
  0x78   :  { %v672_v11 = vadd.f32 %v671_v48, %v544_v21  ;;  %v566_v21 = vand.u32 2147483647, %v2124_v5  ;;  %v2141_v5 = vld [vmem:[#allocation20_spill] sm:$0xff] }
  0x7a   :  { %v673_v10 = vadd.f32 %v672_v11, %v545_v35  ;;  %v567_v35 = vand.u32 2147483647, %v2125_v12  ;;  %v2142_v12 = vld [vmem:[#allocation28_spill] sm:$0xff] }
  0x7c   :  { %v674_v24 = vadd.f32 %v673_v10, %v546_v36  ;;  %v2126_v36 = vld [vmem:[#allocation12_spill] sm:$0xff] }
  0x7d   :  { %v568_v10 = vand.u32 2147483647, %v2126_v36 }
  0x7e   :  { %v675_v28 = vadd.f32 %v674_v24, %v547_v42  ;;  %v2127_v24 = vld [vmem:[#allocation13_spill] sm:$0xff] }
  0x80   :  { %v676_v32 = vadd.f32 %v675_v28, %v548_v43  ;;  %v569_v43 = vand.u32 2147483647, %v2127_v24 }
  0x82   :  { %v677_v30 = vadd.f32 %v676_v32, %v549_v0  ;;  %v2128_v0 = vld [vmem:[#allocation17_spill] sm:$0xff] }
  0x83   :  { %v570_v32 = vand.u32 2147483647, %v2128_v0 }
  0x84   :  { %v678_v38 = vadd.f32 %v677_v30, %v550_v59  ;;  %v2129_v59 = vld [vmem:[#allocation18_spill] sm:$0xff] }
  0x85   :  { %v571_v30 = vand.u32 2147483647, %v2129_v59 }
  0x86   :  { %v679_v41 = vadd.f32 %v678_v38, %v551_v15  ;;  %v2130_v15 = vld [vmem:[#allocation21_spill] sm:$0xff]  ;;  %v1119_v38 = vmov 0.0  }
  0x87   :  { %22 = vst [vmem:[#allocation2] sm:$0x3] %v1119_v38  ;;  %v590_v38 = vand.u32 2147483647, %v1831_v29 }
  0x88   :  { %v680_v54 = vadd.f32 %v679_v41, %v552_v16  ;;  %v572_v16 = vand.u32 2147483647, %v2130_v15  ;;  %v2131_v41 = vld [vmem:[#allocation22_spill] sm:$0xff] }
  0x8a   :  { %v681_v26 = vadd.f32 %v680_v54, %v553_v25 }
  0x8c   :  { %v682_v40 = vadd.f32 %v681_v26, %v554_v52  ;;  %v573_v52 = vand.u32 2147483647, %v2131_v41  ;;  %v591_v41 = vand.u32 2147483647, %v1836_v9  ;;  %v2148_v9 = vld [vmem:[#allocation15_spill] sm:$0xff] }
  0x8e   :  { %v683_v3 = vadd.f32 %v682_v40, %v555_v13  ;;  %v574_v13 = vand.u32 2147483647, %v2132_v50 }
  0x90   :  { %v684_v1 = vadd.f32 %v683_v3, %v556_v14  ;;  %v2133_v14 = vld [vmem:[#allocation27_spill] sm:$0xff]  ;;  %v2134_v3 = vld [vmem:[#allocation32_spill] sm:$0xff] }
  0x91   :  { %v575_v40 = vand.u32 2147483647, %v2133_v14  ;;  %v594_v14 = vand.u32 2147483647, %v1886_v56  ;;  %v2151_v56 = vld [vmem:[#allocation24_spill] sm:$0xff] }
  0x92   :  { %v685_v45 = vadd.f32 %v684_v1, %v557_v20 }
  0x94   :  { %v686_v55 = vadd.f32 %v685_v45, %v558_v27  ;;  %v576_v27 = vand.u32 2147483647, %v2134_v3 }
  0x96   :  { %v687_v51 = vadd.f32 %v686_v55, %v559_v57  ;;  %v577_v57 = vand.u32 2147483647, %v2135_v62  ;;  %v597_v62 = vand.u32 2147483647, %v1915_v58 }
  0x98   :  { %v688_v60 = vadd.f32 %v687_v51, %v560_v63  ;;  %v2136_v63 = vld [vmem:[#allocation38_spill] sm:$0xff]  ;;  %v2137_v51 = vld [vmem:[#allocation39_spill] sm:$0xff] }
  0x99   :  { %v578_v55 = vand.u32 2147483647, %v2136_v63  ;;  %v579_v53 = vand.u32 2147483647, %v2137_v51 }
  0x9a   :  { %v689_v46 = vadd.f32 %v688_v60, %v561_v34  ;;  %v2138_v60 = vld [vmem:[#allocation44_spill] sm:$0xff] }
  0x9b   :  { %v580_v49 = vand.u32 2147483647, %v2138_v60 }
  0x9c   :  { %v690_v44 = vadd.f32 %v689_v46, %v562_v2  ;;  %v2139_v46 = vld [vmem:[#allocation45_spill] sm:$0xff] }
  0x9e   :  { %v691_v19 = vadd.f32 %v690_v44, %v563_v4  ;;  %v2140_v44 = vld [vmem:[#allocation19_spill] sm:$0xff] }
  0xa0   :  { %v692_v48 = vadd.f32 %v691_v19, %v564_v47  ;;  %v581_v47 = vand.u32 2147483647, %v2139_v46 }
  0xa2   :  { %v693_v11 = vadd.f32 %v692_v48, %v565_v61  ;;  %v582_v61 = vand.u32 2147483647, %v2140_v44 }
  0xa4   :  { %v694_v23 = vadd.f32 %v693_v11, %v566_v21  ;;  %v583_v21 = vand.u32 2147483647, %v2141_v5 }
  0xa6   :  { %v695_v42 = vadd.f32 %v694_v23, %v567_v35  ;;  %v584_v35 = vand.u32 2147483647, %v2142_v12  ;;  %v2143_v23 = vld [vmem:[#allocation29_spill] sm:$0xff] }
  0xa7   :  { %v585_v36 = vand.u32 2147483647, %v2143_v23 }
  0xa8   :  { %v696_v28 = vadd.f32 %v695_v42, %v568_v10  ;;  %v2144_v42 = vld [vmem:[#allocation34_spill] sm:$0xff] }
  0xa9   :  { %v586_v24 = vand.u32 2147483647, %v2144_v42  ;;  %v609_v42 = vand.u32 2147483647, %v1846_v7 }
  0xaa   :  { %v697_v37 = vadd.f32 %v696_v28, %v569_v43  ;;  %v2145_v28 = vld [vmem:[#allocation35_spill] sm:$0xff] }
  0xab   :  { %v587_v0 = vand.u32 2147483647, %v2145_v28 }
  0xac   :  { %v698_v39 = vadd.f32 %v697_v37, %v570_v32  ;;  %v2146_v37 = vld [vmem:[#allocation42_spill] sm:$0xff] }
  0xad   :  { %v588_v59 = vand.u32 2147483647, %v2146_v37  ;;  %v2158_v37 = vld [vmem:[#allocation48_spill] sm:$0xff] }
  0xae   :  { %v699_v25 = vadd.f32 %v698_v39, %v571_v30  ;;  %v2147_v39 = vld [vmem:[#allocation43_spill] sm:$0xff] }
  0xaf   :  { %v589_v15 = vand.u32 2147483647, %v2147_v39 }
  0xb0   :  { %v700_v54 = vadd.f32 %v699_v25, %v572_v16 }
  0xb2   :  { %v701_v26 = vadd.f32 %v700_v54, %v573_v52  ;;  %v592_v54 = vand.u32 2147483647, %v1860_v8  ;;  %v2149_v8 = vld [vmem:[#allocation16_spill] sm:$0xff] }
  0xb3   :  { %v599_v63 = vand.u32 2147483647, %v2149_v8 }
  0xb4   :  { %v702_v20 = vadd.f32 %v701_v26, %v574_v13  ;;  %v593_v13 = vand.u32 2147483647, %v1865_v17  ;;  %v2150_v17 = vld [vmem:[#allocation23_spill] sm:$0xff] }
  0xb6   :  { %v703_v1 = vadd.f32 %v702_v20, %v575_v40  ;;  %v595_v20 = vand.u32 2147483647, %v1891_v31  ;;  %v2152_v31 = vld [vmem:[#allocation30_spill] sm:$0xff] }
  0xb7   :  { %v602_v60 = vand.u32 2147483647, %v2152_v31 }
  0xb8   :  { %v704_v45 = vadd.f32 %v703_v1, %v576_v27  ;;  %v596_v1 = vand.u32 2147483647, %v1910_v6 }
  0xba   :  { %v705_v34 = vadd.f32 %v704_v45, %v577_v57  ;;  %v598_v57 = vand.u32 2147483647, %v2148_v9 }
  0xbc   :  { %v706_v2 = vadd.f32 %v705_v34, %v578_v55  ;;  %v600_v34 = vand.u32 2147483647, %v2150_v17 }
  0xbe   :  { %v707_v4 = vadd.f32 %v706_v2, %v579_v53  ;;  %v601_v53 = vand.u32 2147483647, %v2151_v56 }
  0xc0   :  { %v708_v19 = vadd.f32 %v707_v4, %v580_v49  ;;  %v2153_v4 = vld [vmem:[#allocation31_spill] sm:$0xff] }
  0xc1   :  { %v603_v6 = vand.u32 2147483647, %v2153_v4 }
  0xc2   :  { %v709_v48 = vadd.f32 %v708_v19, %v581_v47  ;;  %v2154_v47 = vld [vmem:[#allocation36_spill] sm:$0xff] }
  0xc3   :  { %v604_v58 = vand.u32 2147483647, %v2154_v47 }
  0xc4   :  { %v710_v11 = vadd.f32 %v709_v48, %v582_v61  ;;  %v2155_v61 = vld [vmem:[#allocation37_spill] sm:$0xff] }
  0xc5   :  { %v605_v19 = vand.u32 2147483647, %v2155_v61 }
  0xc6   :  { %v711_v10 = vadd.f32 %v710_v11, %v583_v21  ;;  %v2156_v21 = vld [vmem:[#allocation46_spill] sm:$0xff] }
  0xc7   :  { %v606_v48 = vand.u32 2147483647, %v2156_v21 }
  0xc8   :  { %v712_v43 = vadd.f32 %v711_v10, %v584_v35  ;;  %v2157_v35 = vld [vmem:[#allocation47_spill] sm:$0xff] }
  0xc9   :  { %v607_v11 = vand.u32 2147483647, %v2157_v35 }
  0xca   :  { %v713_v32 = vadd.f32 %v712_v43, %v585_v36  ;;  %v608_v36 = vand.u32 2147483647, %v1841_v22  ;;  %v610_v43 = vand.u32 2147483647, %v1870_v18 }
  0xcc   :  { %v714_v30 = vadd.f32 %v713_v32, %v586_v24 }
  0xce   :  { %v715_v16 = vadd.f32 %v714_v30, %v587_v0  ;;  %v611_v0 = vand.u32 2147483647, %v1875_v33 }
  0xd0   :  { %v716_v25 = vadd.f32 %v715_v16, %v588_v59  ;;  %v612_v59 = vand.u32 2147483647, %v2158_v37 }
  0xd2   :  { %v717_v52 = vadd.f32 %v716_v25, %v589_v15  ;;  %v2159_v15 = vld [vmem:[#allocation49_spill] sm:$0xff] }
  0xd3   :  { %v613_v16 = vand.u32 2147483647, %v2159_v15 }
  0xd4   :  { %v718_v50 = vadd.f32 %v717_v52, %v590_v38 }
  0xd6   :  { %v719_v26 = vadd.f32 %v718_v50, %v591_v41 }
  0xd8   :  { %v720_v40 = vadd.f32 %v719_v26, %v592_v54 }
  0xda   :  { %v721_v3 = vadd.f32 %v720_v40, %v593_v13 }
  0xdc   :  { %v722_v27 = vadd.f32 %v721_v3, %v594_v14 }
  0xde   :  { %v723_v29 = vadd.f32 %v722_v27, %v595_v20 }
  0xe0   :  { %v724_v45 = vadd.f32 %v723_v29, %v596_v1 }
  0xe2   :  { %v725_v55 = vadd.f32 %v724_v45, %v597_v62 }
  0xe4   :  { %v726_v51 = vadd.f32 %v725_v55, %v598_v57 }
  0xe6   :  { %v727_v2 = vadd.f32 %v726_v51, %v599_v63 }
  0xe8   :  { %v728_v49 = vadd.f32 %v727_v2, %v600_v34 }
  0xea   :  { %v729_v46 = vadd.f32 %v728_v49, %v601_v53 }
  0xec   :  { %v730_v44 = vadd.f32 %v729_v46, %v602_v60 }
  0xee   :  { %v731_v5 = vadd.f32 %v730_v44, %v603_v6 }
  0xf0   :  { %v732_v12 = vadd.f32 %v731_v5, %v604_v58 }
  0xf2   :  { %v733_v23 = vadd.f32 %v732_v12, %v605_v19 }
  0xf4   :  { %v734_v10 = vadd.f32 %v733_v23, %v606_v48 }
  0xf6   :  { %v735_v24 = vadd.f32 %v734_v10, %v607_v11 }
  0xf8   :  { %v736_v28 = vadd.f32 %v735_v24, %v608_v36  ;;  %v828_v39 = vpop.f32.mrb[0].mxu0 }
  0xf9   :  { %v829_v25 = vpop.f32.mrb[1].mxu0 }
  0xfa   :  { %v737_v32 = vadd.f32 %v736_v28, %v609_v42  ;;  %v830_v41 = vadd.f32 %v829_v25, %v828_v39 }
  0xfc   :  { %v738_v30 = vadd.f32 %v737_v32, %v610_v43 }
  0xfe   :  { %v739_v38 = vadd.f32 %v738_v30, %v611_v0 }
 0x100   :  { %v740_v22 = vadd.f32 %v739_v38, %v612_v59 }
 0x102   :  { %v741_v52 = vadd.f32 %v740_v22, %v613_v16 }
 0x104   :  { %v758_v54 = vrot.slane %v741_v52, 4 }
 0x105   :  { %v863_v33 = vpop.f32.mrb[0].mxu1 }
 0x106   :  { %v759_v7 = vadd.f32 %v758_v54, %v741_v52  ;;  %v864_v26 = vpop.f32.mrb[1].mxu1 }
 0x107   :  { %v865_v40 = vadd.f32 %v864_v26, %v863_v33 }
 0x108   :  { %v760_v50 = vrot.slane %v759_v7, 2 }
 0x109   :  { %v341_v20 = vadd.f32 %v865_v40, %v830_v41 }
 0x10a   :  { %v761_v13 = vadd.f32 %v760_v50, %v759_v7 }
 0x10c   :  { %v762_v18 = vrot.slane %v761_v13, 1 }
 0x10e   :  { %v763_v14 = vadd.f32 %v762_v18, %v761_v13 }
 0x110   :  { %764 = vst [vmem:[#allocation6] sm:$0x1] %v763_v14 }
 0x111   :  { %1081 = shalt.err (!%p1078_p4)
}
 0x112   :  { %s1082_s18 = scalar_lea.hbm %s2039_s4, 16 }
 0x113   :  { %p1083_p5 = scmp.ne.s32.totalorder %s2039_s4, %s1082_s18  ;;  %p1086_p6 = scmp.lt.u32.totalorder %s1082_s18, %s2039_s4 }
 0x115   :  { %p1088_p7 = pnand %p1086_p6, %p1083_p5 }
 0x117   :  { %1091 = shalt.err (!%p1088_p7)
}
 0x118   :  { %784 = dma.vmem_to_hbm [thread:$0]  %s782_s13, 16, %s2039_s4, [#allocation7]   ;;  %v159_v45 = vld [vmem:[#allocation2] sm:$0x3] }
 0x119   :  { %v795_v55 = vld [vmem:[%s2037_s2] ss:$0 sm:$0xff]  ;;  %s1121_s27 = smov [#allocation4]  }
 0x11a   :  { %s771_s28 = sshll.u32 %s1121_s27, 4  ;;  %s772_s28 = int_to_ptr.vmem [resolvable:$true] %s771_s28 }
 0x11b   :  { %s1092_s4 = scalar_lea.vmem %s772_s28, 32  ;;  %p1097_p9 = scmp.lt.s32.totalorder %s772_s28, %s772_s28 }
 0x11c   :  { %p1093_p8 = scmp.ne.s32.totalorder %s772_s28, %s1092_s4  ;;  %p1098_p10 = scmp.lt.s32.totalorder %s1092_s4, %s1092_s4 }
 0x11e   :  { %v898_v3 = vpop.f32.mrb[2].mxu0  ;;  %p1099_p11 = por %p1098_p10, %p1097_p9 }
 0x11f   :  { %v899_v27 = vpop.f32.mrb[3].mxu0 }
 0x120   :  { %v900_v1 = vadd.f32 %v899_v27, %v898_v3  ;;  %p1100_p12 = pnand %p1099_p11, %p1093_p8 }
 0x122   :  { %v411_v29 = vadd.f32 %v900_v1, %v341_v20 }
 0x12b   :  { %v933_v62 = vpop.f32.mrb[2].mxu1 }
 0x12c   :  { %v934_v9 = vpop.f32.mrb[3].mxu1 }
 0x12d   :  { %v935_v57 = vadd.f32 %v934_v9, %v933_v62 }
 0x12f   :  { %v481_v8 = vadd.f32 %v935_v57, %v411_v29 }
 0x131   :  { %v484_v63 = vadd.f32 %v481_v8, %v159_v45 }
 0x133   :  { %485 = vst [vmem:[#allocation2] sm:$0x3] %v484_v63 }
 0x13a   :  { %v747_v17 = vld [vmem:[#allocation2] sm:$0x3] }
 0x13b   :  { %v755_v34 = vadd.f32 %v795_v55, %v747_v17 }
 0x13d   :  { %756 = vst [vmem:[#allocation4] sm:$0x3] %v755_v34 }
 0x13e   :  { %1103 = shalt.err (!%p1100_p12)
}
 0x13f   :  { %s1104_s5 = scalar_lea.hbm %s2038_s3, 32 }
 0x140   :  { %p1105_p13 = scmp.ne.s32.totalorder %s2038_s3, %s1104_s5  ;;  %p1108_p0 = scmp.lt.u32.totalorder %s1104_s5, %s2038_s3 }
 0x142   :  { %p1110_p1 = pnand %p1108_p0, %p1105_p13 }
 0x144   :  { %1113 = shalt.err (!%p1110_p1)
}
 0x145   :  { %774 = dma.vmem_to_hbm [thread:$0]  %s772_s28, 32, %s2038_s3, [#allocation5]  }
 0x146   :  { %1114 = dma.done.wait [#allocation5], 32  }
 0x147   :  { %1115 = vsyncadd [#allocation5], 4294967264 }
 0x148   :  { %1116 = dma.done.wait [#allocation7], 16  }
 0x149   :  { %1117 = vsyncadd [#allocation7], 4294967280 }
 0x14a   :  { %791 = vsyncpa [#allocation5], 1 }
 0x14b   :  { %792 = vsyncpa [#allocation7], 1 }

</bundles_post_ra>
